<compile_context>
chip_gen: v6e
topology: v6e:2x2x1
jax: 0.10.0
libtpu: 0.0.40
codegen_flags: <defaults>
</compile_context>

<pallas_src>
import functools

import jax
import jax.numpy as jnp
from jax.experimental import pallas as pl
from jax.experimental.pallas import tpu as pltpu

KH = KW = 3  # conv kernel size


def custom_conv2_kernel(p_ref, wc_ref, bc_ref, wl_ref, bl_ref, o_ref, *, n_batch, hw):
    # p_ref : (K, B*HW)    im2col patches; K ordered (kh, kw, cin); lanes ordered (b, h, w)
    # wc_ref: (Cout, K)    conv weight, taps flattened into the contraction axis
    # bc_ref: (Cout, 1)    conv bias (column)
    # wl_ref: (Cout, Cout) linear weight, (out, in)
    # bl_ref: (Cout, 1)    linear bias (column)
    # o_ref : (Cout, B*HW) output, channel-major, lane-dense

    # Whole-batch 3x3 same-padding conv == single MXU matmul: (16,36)@(36,512) -> (16,512).
    acc = jnp.dot(wc_ref[...], p_ref[...],
                  preferred_element_type=jnp.float32) + bc_ref[...]       # (Cout, B*HW)

    # AdaptiveAvgPool2d((1,1)) per batch element: static 128-aligned lane slices + XLU reduce.
    ap = jnp.concatenate(
        [jnp.mean(acc[:, b * hw:(b + 1) * hw], axis=1, keepdims=True)
         for b in range(n_batch)], axis=1)                                # (Cout, B)

    # scale = Sigmoid(Linear(ap)) for all batch elements in one N=B dot.
    s = jax.nn.sigmoid(
        jnp.dot(wl_ref[...], ap, preferred_element_type=jnp.float32)
        + bl_ref[...])                                                    # (Cout, B)

    # Gate each batch element's 256-lane half and store (unmasked, 128-aligned slices).
    for b in range(n_batch):
        o_ref[:, b * hw:(b + 1) * hw] = (
            acc[:, b * hw:(b + 1) * hw] * s[:, b:b + 1]).astype(o_ref.dtype)


@jax.jit
def custom_conv2(x_nchw, w_conv_oihw, b_conv, w_lin, b_lin):
    """x_nchw: (B, Cin, H, W); w_conv_oihw: (Cout, Cin, 3, 3); w_lin: (Cout, Cout) [out, in]."""
    B, Cin, H, W = x_nchw.shape
    Cout = w_conv_oihw.shape[0]
    HW = H * W
    BHW = B * HW
    K = KH * KW * Cin

    # Glue (tiny XLA producer; allow_input_fusion lets it fold into the pallas_call):
    # zero-pad for padding=1 and build im2col patches with K=(kh,kw,cin), lanes=(b,h,w).
    x_pad = jnp.pad(x_nchw, ((0, 0), (0, 0), (1, 1), (1, 1)))
    taps = jnp.stack([x_pad[:, :, kh:kh + H, kw:kw + W]
                      for kh in range(KH) for kw in range(KW)], axis=0)   # (9, B, Cin, H, W)
    patches = jnp.transpose(taps, (0, 2, 1, 3, 4)).reshape(K, BHW)        # (36, 512)

    # Conv weight OIHW -> (Cout, KH*KW*Cin), matching the patch K-ordering (kh, kw, cin).
    w_flat = jnp.transpose(w_conv_oihw, (0, 2, 3, 1)).reshape(Cout, K)    # (16, 36)
    bc = b_conv.reshape(Cout, 1)
    bl = b_lin.reshape(Cout, 1)

    # Advisory cost estimate so XLA's scheduler overlaps this launch-bound call.
    flops = 2 * Cout * K * BHW + 2 * Cout * Cout * B + 2 * Cout * BHW
    bytes_accessed = 4 * (K * BHW + Cout * BHW + Cout * K + Cout * Cout + 2 * Cout)

    kernel = functools.partial(custom_conv2_kernel, n_batch=B, hw=HW)

    out_flat = pl.pallas_call(
        kernel,
        out_shape=jax.ShapeDtypeStruct((Cout, BHW), x_nchw.dtype),
        in_specs=[pl.BlockSpec(memory_space=pltpu.MemorySpace.VMEM)] * 5,
        out_specs=pl.BlockSpec(memory_space=pltpu.MemorySpace.VMEM),
        compiler_params=pltpu.CompilerParams(
            allow_input_fusion=[True, False, False, False, False]),
        cost_estimate=pl.CostEstimate(
            flops=flops, transcendentals=B * Cout, bytes_accessed=bytes_accessed),
    )(patches, w_flat, bc, w_lin, bl)

    # Lane axis is (b, h, w): split it back and move batch in front -> NCHW.
    return out_flat.reshape(Cout, B, H, W).transpose(1, 0, 2, 3)


if __name__ == "__main__":
    key = jax.random.PRNGKey(0)
    kx, kwc, kbc, kwl, kbl = jax.random.split(key, 5)

    B, Cin, H, W, Cout = 2, 4, 16, 16, 16
    x = jax.random.normal(kx, (B, Cin, H, W), jnp.float32)
    # Deterministic synthetic parameters (shapes from nn.Conv2d(4,16,3,padding=1), nn.Linear(16,16)).
    w_conv = jax.random.normal(kwc, (Cout, Cin, 3, 3), jnp.float32) * 0.1   # OIHW
    b_conv = jax.random.normal(kbc, (Cout,), jnp.float32) * 0.1
    w_lin = jax.random.normal(kwl, (Cout, Cout), jnp.float32) * 0.1         # (out, in)
    b_lin = jax.random.normal(kbl, (Cout,), jnp.float32) * 0.1

    out = jax.block_until_ready(custom_conv2(x, w_conv, b_conv, w_lin, b_lin))

    # Plain-JAX reference for correctness (same math as the PyTorch module).
    conv = jax.lax.conv_general_dilated(
        x, w_conv, window_strides=(1, 1), padding="SAME",
        dimension_numbers=("NCHW", "OIHW", "NCHW")) + b_conv[None, :, None, None]
    ap = conv.mean(axis=(2, 3))
    s = jax.nn.sigmoid(ap @ w_lin.T + b_lin)
    ref = conv * s[:, :, None, None]

    assert out.shape == (B, Cout, H, W), out.shape
    assert jnp.allclose(out, ref, rtol=1e-4, atol=1e-4), float(jnp.max(jnp.abs(out - ref)))
    print("KERNEL_OK")
</pallas_src>

<mosaic_0001>
module attributes {stable_mosaic.version = 11 : i64} {
  func.func @custom_conv2_kernel(%arg0: memref<36x512xf32, #tpu.memory_space<vmem>>, %arg1: memref<16x36xf32, #tpu.memory_space<vmem>>, %arg2: memref<16x1xf32, #tpu.memory_space<vmem>>, %arg3: memref<16x16xf32, #tpu.memory_space<vmem>>, %arg4: memref<16x1xf32, #tpu.memory_space<vmem>>, %arg5: memref<16x512xf32, #tpu.memory_space<vmem>>) attributes {dimension_semantics = [], scalar_prefetch = 0 : i64, scratch_operands = 0 : i64, tpu.core_type = #tpu.core_type<tc>} {
    %c0 = arith.constant 0 : index
    %c0_0 = arith.constant 0 : index
    %0 = vector.load %arg1[%c0, %c0_0] : memref<16x36xf32, #tpu.memory_space<vmem>>, vector<16x36xf32>
    %c0_1 = arith.constant 0 : index
    %c0_2 = arith.constant 0 : index
    %1 = vector.load %arg0[%c0_1, %c0_2] : memref<36x512xf32, #tpu.memory_space<vmem>>, vector<36x512xf32>
    %cst = arith.constant dense<0.000000e+00> : vector<16x512xf32>
    %2 = tpu.matmul %0, %1, %cst {dimension_numbers = #tpu.dot_dimension_numbers<[1], [0], [0], [1], [0, 0, 1, 1], [], []>} : vector<16x36xf32>, vector<36x512xf32>, vector<16x512xf32> -> vector<16x512xf32>
    %c0_3 = arith.constant 0 : index
    %c0_4 = arith.constant 0 : index
    %3 = vector.load %arg2[%c0_3, %c0_4] : memref<16x1xf32, #tpu.memory_space<vmem>>, vector<16x1xf32>
    %4 = vector.broadcast %3 : vector<16x1xf32> to vector<16x512xf32>
    %5 = arith.addf %2, %4 : vector<16x512xf32>
    %6 = vector.extract_strided_slice %5 {offsets = [0, 0], sizes = [16, 256], strides = [1, 1]} : vector<16x512xf32> to vector<16x256xf32>
    %cst_5 = arith.constant dense<0.000000e+00> : vector<16xf32>
    %7 = vector.multi_reduction <add>, %6, %cst_5 [1] : vector<16x256xf32> to vector<16xf32>
    %8 = vector.shape_cast %7 : vector<16xf32> to vector<16x1xf32>
    %cst_6 = arith.constant 2.560000e+02 : f32
    %9 = vector.broadcast %cst_6 : f32 to vector<16x1xf32>
    %10 = arith.divf %8, %9 : vector<16x1xf32>
    %11 = vector.extract_strided_slice %5 {offsets = [0, 256], sizes = [16, 256], strides = [1, 1]} : vector<16x512xf32> to vector<16x256xf32>
    %cst_7 = arith.constant dense<0.000000e+00> : vector<16xf32>
    %12 = vector.multi_reduction <add>, %11, %cst_7 [1] : vector<16x256xf32> to vector<16xf32>
    %13 = vector.shape_cast %12 : vector<16xf32> to vector<16x1xf32>
    %cst_8 = arith.constant 2.560000e+02 : f32
    %14 = vector.broadcast %cst_8 : f32 to vector<16x1xf32>
    %15 = arith.divf %13, %14 : vector<16x1xf32>
    %16 = tpu.concatenate %10, %15 in 1 : vector<16x1xf32>, vector<16x1xf32> -> vector<16x2xf32>
    %c0_9 = arith.constant 0 : index
    %c0_10 = arith.constant 0 : index
    %17 = vector.load %arg3[%c0_9, %c0_10] : memref<16x16xf32, #tpu.memory_space<vmem>>, vector<16x16xf32>
    %cst_11 = arith.constant dense<0.000000e+00> : vector<16x2xf32>
    %18 = tpu.matmul %17, %16, %cst_11 {dimension_numbers = #tpu.dot_dimension_numbers<[1], [0], [0], [1], [0, 0, 1, 1], [], []>} : vector<16x16xf32>, vector<16x2xf32>, vector<16x2xf32> -> vector<16x2xf32>
    %c0_12 = arith.constant 0 : index
    %c0_13 = arith.constant 0 : index
    %19 = vector.load %arg4[%c0_12, %c0_13] : memref<16x1xf32, #tpu.memory_space<vmem>>, vector<16x1xf32>
    %20 = vector.broadcast %19 : vector<16x1xf32> to vector<16x2xf32>
    %21 = arith.addf %18, %20 : vector<16x2xf32>
    %22 = arith.negf %21 : vector<16x2xf32>
    %23 = math.exp %22 : vector<16x2xf32>
    %cst_14 = arith.constant 1.000000e+00 : f32
    %24 = vector.broadcast %cst_14 : f32 to vector<16x2xf32>
    %25 = arith.addf %24, %23 : vector<16x2xf32>
    %26 = arith.divf %24, %25 : vector<16x2xf32>
    %27 = vector.extract_strided_slice %5 {offsets = [0, 0], sizes = [16, 256], strides = [1, 1]} : vector<16x512xf32> to vector<16x256xf32>
    %28 = vector.extract_strided_slice %26 {offsets = [0, 0], sizes = [16, 1], strides = [1, 1]} : vector<16x2xf32> to vector<16x1xf32>
    %29 = vector.broadcast %28 : vector<16x1xf32> to vector<16x256xf32>
    %30 = arith.mulf %27, %29 : vector<16x256xf32>
    %c0_15 = arith.constant 0 : index
    %c0_16 = arith.constant 0 : index
    %31 = vector.load %arg5[%c0_15, %c0_16] : memref<16x512xf32, #tpu.memory_space<vmem>>, vector<16x256xf32>
    tpu.vector_store %arg5[%c0_15, %c0_16], %30 {strides = array<i32>} : memref<16x512xf32, #tpu.memory_space<vmem>>, vector<16x256xf32>,
    %32 = vector.extract_strided_slice %5 {offsets = [0, 256], sizes = [16, 256], strides = [1, 1]} : vector<16x512xf32> to vector<16x256xf32>
    %33 = vector.extract_strided_slice %26 {offsets = [0, 1], sizes = [16, 1], strides = [1, 1]} : vector<16x2xf32> to vector<16x1xf32>
    %34 = vector.broadcast %33 : vector<16x1xf32> to vector<16x256xf32>
    %35 = arith.mulf %32, %34 : vector<16x256xf32>
    %c0_17 = arith.constant 0 : index
    %c256 = arith.constant 256 : index
    %36 = vector.load %arg5[%c0_17, %c256] : memref<16x512xf32, #tpu.memory_space<vmem>>, vector<16x256xf32>
    tpu.vector_store %arg5[%c0_17, %c256], %35 {strides = array<i32>} : memref<16x512xf32, #tpu.memory_space<vmem>>, vector<16x256xf32>,
    return
  }
}

</mosaic_0001>

<bundles_post_ra>
// kernel: custom_conv2.1
= control target key start
LH: loop header
LB: loop body
LE: loop exit
PB: predicated region body
PF: predicated region fallthrough
CT: control target
= control target key end

     0   :  { %vm61_vm0 = vcmask 1043456   ;;  %v432_v3 = vmov 0.0   ;;  %vm54_vm1 = vcmask 293888   ;;  %v433_v24 = vmov 0   ;;  %s611_s0 = inlined_call_operand.vmem [shape: f32[36,512], index: 0, kind: input, shape index: {}]   ;;  %s612_s1 = inlined_call_operand.vmem [shape: f32[16,36], index: 1, kind: input, shape index: {}]   ;;  %s613_s2 = inlined_call_operand.vmem [shape: f32[16,1], index: 2, kind: input, shape index: {}]   ;;  %s614_s3 = inlined_call_operand.vmem [shape: f32[16,16], index: 3, kind: input, shape index: {}]   ;;  %s615_s4 = inlined_call_operand.vmem [shape: f32[16,1], index: 4, kind: input, shape index: {}]   ;;  %s616_s5 = inlined_call_operand.vmem [shape: f32[16,512], index: 5, kind: output, shape index: {}]  }
   0x1   :  { %v39_v0 = vld [vmem:[%s611_s0 + $0x88] sm:$0xf]  ;;  %v41_v1 = vld [vmem:[%s611_s0 + $0x98] sm:$0xf]  ;;  %v38_v2 = vld [vmem:[%s611_s0 + $0x80] sm:$0xf]  ;;  %138 = vmatprep.mubr.f32.mxu0 %v432_v3  ;;  %215 = vmatprep.mubr.f32.mxu1 %v432_v3 }
   0x2   :  { %394 = vmatprep.subr.msk.mxu0 %vm61_vm0, %v39_v0  ;;  %398 = vmatprep.subr.msk.mxu1 %vm61_vm0, %v41_v1  ;;  %v40_v4 = vld [vmem:[%s611_s0 + $0x90] sm:$0xf]  ;;  %v35_v5 = vld [vmem:[%s611_s0 + $0x68] sm:$0xff]  ;;  %v37_v6 = vld [vmem:[%s611_s0 + $0x78] sm:$0xff]  ;;  %vm262_vm2 = vcmask 130048   ;;  %vm245_vm3 = vcmask 7168  }
   0x3   :  { %395 = vmatpush1.msk.msra.mxu0 %vm61_vm0, %v38_v2  ;;  %399 = vmatpush1.msk.msra.mxu1 %vm61_vm0, %v40_v4  ;;  %v34_v7 = vld [vmem:[%s611_s0 + $0x60] sm:$0xff]  ;;  %v36_v8 = vld [vmem:[%s611_s0 + $0x70] sm:$0xff]  ;;  %v31_v9 = vld [vmem:[%s611_s0 + $0x48] sm:$0xff]  ;;  %v434_v62 = vmov 1  }
   0x4   :  { %98 = vmatprep.subr.mxu0 %v35_v5  ;;  %175 = vmatprep.subr.mxu1 %v37_v6  ;;  %v33_v10 = vld [vmem:[%s611_s0 + $0x58] sm:$0xff]  ;;  %v30_v11 = vld [vmem:[%s611_s0 + $0x40] sm:$0xff]  ;;  %v32_v12 = vld [vmem:[%s611_s0 + $0x50] sm:$0xff] }
   0x5   :  { %99 = vmatpush1.msra.mxu0 %v34_v7  ;;  %176 = vmatpush1.msra.mxu1 %v36_v8  ;;  %v27_v13 = vld [vmem:[%s611_s0 + $0x28] sm:$0xff]  ;;  %v29_v14 = vld [vmem:[%s611_s0 + $0x38] sm:$0xff]  ;;  %v26_v15 = vld [vmem:[%s611_s0 + $0x20] sm:$0xff] }
   0x6   :  { %100 = vmatprep.subr.mxu0 %v31_v9  ;;  %177 = vmatprep.subr.mxu1 %v33_v10  ;;  %v28_v16 = vld [vmem:[%s611_s0 + $0x30] sm:$0xff]  ;;  %v23_v17 = vld [vmem:[%s611_s0 + $0x8] sm:$0xff]  ;;  %v25_v18 = vld [vmem:[%s611_s0 + $0x18] sm:$0xff] }
   0x7   :  { %101 = vmatpush1.msra.mxu0 %v30_v11  ;;  %178 = vmatpush1.msra.mxu1 %v32_v12  ;;  %v22_v19 = vld [vmem:[%s611_s0] sm:$0xff]  ;;  %v24_v20 = vld [vmem:[%s611_s0 + $0x10] sm:$0xff]  ;;  %v43_v22 = vld [vmem:[%s613_s2 + $0x8] sm:$0xff] }
   0x8   :  { %102 = vmatprep.subr.mxu0 %v27_v13  ;;  %179 = vmatprep.subr.mxu1 %v29_v14  ;;  %v20_v21 = vld [vmem:[%s612_s1] sm:$0xff]  ;;  %v21_v23 = vld [vmem:[%s612_s1 + $0x8] sm:$0xff] }
   0x9   :  { %103 = vmatpush1.msra.mxu0 %v26_v15  ;;  %180 = vmatpush1.msra.mxu1 %v28_v16  ;;  %v42_v25 = vld [vmem:[%s613_s2] sm:$0xff]  ;;  %v251_v50 = vld [vmem:[%s615_s4 + $0x8] sm:$0xff] }
   0xa   :  { %104 = vmatprep.subr.mxu0 %v23_v17  ;;  %181 = vmatprep.subr.mxu1 %v25_v18  ;;  %v248_v48 = vld [vmem:[%s614_s3] sm:$0xff]  ;;  %v249_v61 = vld [vmem:[%s614_s3 + $0x8] sm:$0xff] }
   0xb   :  { %105 = vmatpush1.msra.mxu0 %v22_v19  ;;  %182 = vmatpush1.msra.mxu1 %v24_v20  ;;  %v250_v49 = vld [vmem:[%s615_s4] sm:$0xff] }
   0xc   :  { %396 = vmatmul.mubr.msk.f32.vlgmr.msra.gmra.mxu0 %vm54_vm1, %v20_v21  ;;  %400 = vmatmul.mubr.msk.f32.vlgmr.msra.gmra.mxu1 %vm54_vm1, %v20_v21 }
   0xd   :  { %144 = vmatprep.mubr.f32.mxu0 %v432_v3  ;;  %221 = vmatprep.mubr.f32.mxu1 %v432_v3 }
   0xe   :  { %420 = vset.pattern.permute.xlu0 %v433_v24  ;;  %421 = vset.pattern.permute.xlu1 %v433_v24 }
   0xf   :  { %51 = vperm.xlu0 %420, %v43_v22  }
  0x10   :  { %397 = vmatmul.mubr.msk.f32.gmra.mxu0 %vm54_vm1, %v21_v23  ;;  %401 = vmatmul.mubr.msk.f32.gmra.mxu1 %vm54_vm1, %v21_v23 }
  0x11   :  { %414 = vmatprep.mubr.msk.f32.mxu0 %vm262_vm2, %v248_v48 }
  0x13   :  { %46 = vperm.xlu0 %420, %v42_v25  }
  0x17   :  { %422 = vset.pattern.permute.xlu0 %v434_v62 }
  0x8a   :  { %v52_v26 = vpop.permute.xlu0 %51 }
  0x8e   :  { %v47_v27 = vpop.permute.xlu0 %46 }
  0xcc   :  { %v140_v28 = vpop.f32.mrf.mxu0  ;;  %v217_v29 = vpop.f32.mrf.mxu1 }
  0xcd   :  { %v541_v32 = vadd.f32 %v140_v28, %v47_v27  ;;  %v557_v44 = vadd.f32 %v217_v29, %v47_v27 }
  0xce   :  { %v142_v30 = vpop.f32.mrf.mxu0  ;;  %v219_v31 = vpop.f32.mrf.mxu1 }
  0xcf   :  { %v543_v33 = vadd.f32 %v142_v30, %v47_v27  ;;  %v559_v45 = vadd.f32 %v219_v31, %v47_v27 }
  0xd0   :  { %v146_v34 = vpop.f32.mrf.mxu0  ;;  %v223_v35 = vpop.f32.mrf.mxu1 }
  0xd1   :  { %v228_v36 = vadd.f32 %v543_v33, %v541_v32  ;;  %v547_v39 = vadd.f32 %v146_v34, %v52_v26  ;;  %v551_v41 = vadd.f32 %v223_v35, %v52_v26  ;;  %v237_v47 = vadd.f32 %v559_v45, %v557_v44 }
  0xd2   :  { %v148_v37 = vpop.f32.mrf.mxu0  ;;  %v225_v38 = vpop.f32.mrf.mxu1 }
  0xd3   :  { %v549_v40 = vadd.f32 %v148_v37, %v52_v26  ;;  %229 = vadd.xlane.f32.xlu0 %v228_v36  ;;  %v553_v42 = vadd.f32 %v225_v38, %v52_v26 }
  0xd5   :  { %v231_v43 = vadd.f32 %v549_v40, %v547_v39  ;;  %v240_v46 = vadd.f32 %v553_v42, %v551_v41 }
  0xd7   :  { %232 = vadd.xlane.f32.xlu1 %v231_v43 }
  0xdb   :  { %241 = vadd.xlane.f32.xlu1 %v240_v46 }
  0xdf   :  { %238 = vadd.xlane.f32.xlu1 %v237_v47 }
  0xf0   :  { %254 = vperm.xlu1 %421, %v250_v49  }
  0xf4   :  { %259 = vperm.xlu1 %421, %v251_v50  }
 0x15c   :  { %v230_v55 = vpop.xlane.xlu0 %229 }
 0x15d   :  { %v235_v58 = vmul.f32 0.00390625, %v230_v55 }
 0x160   :  { %v233_v51 = vpop.xlane.xlu1 %232 }
 0x161   :  { %v236_v53 = vmul.f32 0.00390625, %v233_v51 }
 0x164   :  { %v242_v52 = vpop.xlane.xlu1 %241 }
 0x165   :  { %v244_v54 = vmul.f32 0.00390625, %v242_v52 }
 0x167   :  { %v247_v56 = vsel %vm245_vm3, %v236_v53, %v244_v54 }
 0x168   :  { %410 = vmatprep.subr.mxu0 %v247_v56  ;;  %v239_v57 = vpop.xlane.xlu1 %238 }
 0x169   :  { %v243_v59 = vmul.f32 0.00390625, %v239_v57  ;;  %411 = vmatpush3.msra.mxu0 %v247_v56 }
 0x16b   :  { %v246_v60 = vsel %vm245_vm3, %v235_v58, %v243_v59 }
 0x16c   :  { %412 = vmatprep.subr.mxu0 %v246_v60  ;;  %v255_v63 = vpop.permute.xlu1 %254 }
 0x16d   :  { %413 = vmatpush3.msra.mxu0 %v246_v60 }
 0x16e   :  { %415 = vmatmul.mubr.msk.f32.vlgmr.msra.gmra.mxu0 %vm262_vm2, %v249_v61 }
 0x170   :  { %v260_v0 = vpop.permute.xlu1 %259 }
 0x22e   :  { %v416_v1 = vpop.f32.mrf.mxu0 }
 0x22f   :  { %v341_v2 = vadd.f32 %v416_v1, %v260_v0 }
 0x230   :  { %v335_v3 = vpop.f32.mrf.mxu0 }
 0x231   :  { %v405_v4 = vmul.f32 -1.442695, %v341_v2  ;;  %v336_v5 = vadd.f32 %v335_v3, %v255_v63 }
 0x233   :  { %424 = vpow2.f32 %v405_v4  ;;  %v404_v6 = vmul.f32 -1.442695, %v336_v5 }
 0x235   :  { %426 = vpow2.f32 %v404_v6 }
 0x240   :  { %v425_v7 = vpop.eup %424 }
 0x241   :  { %v351_v8 = vadd.f32 1.0, %v425_v7 }
 0x242   :  { %v427_v9 = vpop.eup %426 }
 0x243   :  { %428 = vrcp.f32 %v351_v8  ;;  %v350_v10 = vadd.f32 1.0, %v427_v9 }
 0x245   :  { %430 = vrcp.f32 %v350_v10 }
 0x250   :  { %v429_v11 = vpop.eup %428 }
 0x251   :  { %363 = vperm.xlu1 %421, %v429_v11  }
 0x252   :  { %v431_v12 = vpop.eup %430 }
 0x253   :  { %375 = vperm.xlu0 %422, %v431_v12  }
 0x255   :  { %358 = vperm.xlu1 %421, %v431_v12  }
 0x259   :  { %423 = vset.pattern.permute.xlu1 %v434_v62 }
 0x25a   :  { %379 = vperm.xlu1 %423, %v429_v11  }
 0x2cc   :  { %v364_v13 = vpop.permute.xlu1 %363 }
 0x2cd   :  { %v368_v14 = vmul.f32 %v364_v13, %v547_v39  ;;  %v369_v15 = vmul.f32 %v364_v13, %v549_v40 }
 0x2ce   :  { %v376_v16 = vpop.permute.xlu0 %375 }
 0x2cf   :  { %372 = vst [vmem:[%s616_s5 + $0x20] sm:$0xff] %v368_v14  ;;  %373 = vst [vmem:[%s616_s5 + $0x28] sm:$0xff] %v369_v15  ;;  %v382_v17 = vmul.f32 %v376_v16, %v557_v44  ;;  %v383_v18 = vmul.f32 %v376_v16, %v559_v45 }
 0x2d0   :  { %v359_v19 = vpop.permute.xlu1 %358 }
 0x2d1   :  { %386 = vst [vmem:[%s616_s5 + $0x10] sm:$0xff] %v382_v17  ;;  %387 = vst [vmem:[%s616_s5 + $0x18] sm:$0xff] %v383_v18  ;;  %v366_v20 = vmul.f32 %v359_v19, %v541_v32  ;;  %v367_v21 = vmul.f32 %v359_v19, %v543_v33 }
 0x2d3   :  { %370 = vst [vmem:[%s616_s5] sm:$0xff] %v366_v20  ;;  %371 = vst [vmem:[%s616_s5 + $0x8] sm:$0xff] %v367_v21 }
 0x2d5   :  { %v380_v22 = vpop.permute.xlu1 %379 }
 0x2d6   :  { %v384_v23 = vmul.f32 %v380_v22, %v551_v41  ;;  %v385_v24 = vmul.f32 %v380_v22, %v553_v42 }
 0x2d8   :  { %388 = vst [vmem:[%s616_s5 + $0x30] sm:$0xff] %v384_v23  ;;  %389 = vst [vmem:[%s616_s5 + $0x38] sm:$0xff] %v385_v24 }

</bundles_post_ra>
